<compile_context>
chip_gen: v6e
topology: v6e:2x2x1
jax: 0.10.0
libtpu: 0.0.40
codegen_flags: <defaults>
</compile_context>

<pallas_src>
import jax
import jax.numpy as jnp
from jax.experimental import pallas as pl
from jax.experimental.pallas import tpu as pltpu

IN_FEATURES = 28 * 28   # 784
HIDDEN = 400
HIDDEN_PAD = 512        # pad fc1 N / fc2 K to a multiple of 128 (lane/MXU aligned)
LATENT = 20
OUT_PAD = 128           # lane-dense output slab: [sample | mean | logvar | 0]
DEFAULT_BATCH_TILE = 1024


def _round_up(x, m):
    return (x + m - 1) // m * m


def _choose_batch_tile(b, batch_tile):
    """Pick (tile, padded_batch).

    Prefers (a) >= 2 tiles when the batch is large enough, so the 'parallel'
    grid axis shards across both TensorCores on v7x (harmless on v5e/v6e), and
    (b) a tile that divides the 8-rounded batch exactly, so the wrapper never
    has to jnp.pad-copy the dominant (B, 784) x stream just for tiling.
    """
    b8 = _round_up(b, 8)
    if b8 <= 16:
        return b8, b8
    if b8 > 2 * batch_tile:
        target = batch_tile
    else:
        # aim for at least 2 tiles (v7x megacore), capped at batch_tile
        target = min(batch_tile, _round_up(pl.cdiv(b8, 2), 8))
    # Largest multiple-of-8 tile <= target that divides b8 exactly (no padding).
    best = 8
    for cand in range(target, 7, -8):
        if b8 % cand == 0:
            best = cand
            break
    if best >= max(8, target // 2):
        return best, b8                       # exact tiling: at most 7 pad rows
    return target, _round_up(b8, target)      # rare fallback: pad batch to tile


def encoder_kernel(x_ref, noise_ref, w1_ref, b1_ref, wh_ref, bh_ref, out_ref):
    # fc1 + ReLU: bf16 MXU matmul, f32 accumulation.  Padded hidden lanes
    # (400:512) come out exactly 0 (zero weight columns, zero bias), so the
    # head matmul's padded K rows contribute nothing.
    x = x_ref[...].astype(jnp.bfloat16)                               # no-op if x is bf16
    h = jnp.dot(x, w1_ref[...], preferred_element_type=jnp.float32)
    h = jnp.maximum(h + b1_ref[...], 0.0)                             # (TB, 512) f32

    # Fused heads, already laid out as the output slab:
    # lanes [0:20]=0, [20:40]=mean, [40:60]=logvar, [60:128]=0.
    heads = jnp.dot(h.astype(jnp.bfloat16), wh_ref[...],
                    preferred_element_type=jnp.float32) + bh_ref[...]  # (TB, 128)
    mean = heads[:, LATENT:2 * LATENT]                                 # (TB, 20)
    logvar = heads[:, 2 * LATENT:3 * LATENT]                           # (TB, 20)

    # Reparameterization (f32 epilogue): sample = noise * exp(0.5*logvar) + mean
    std = jnp.exp(0.5 * logvar)
    sample = noise_ref[...].astype(jnp.float32) * std + mean           # (TB, 20)

    # One full lane-dense store + one 20-lane store (sample overwrites lanes 0:20).
    out_ref[...] = heads.astype(out_ref.dtype)
    out_ref[:, 0:LATENT] = sample.astype(out_ref.dtype)


def pack_params(params):
    """Pad / pack torch-layout params into the kernel layout (bf16 weights, f32 biases).

    Head weights are placed so the head matmul directly produces the output
    slab: mean -> lanes 20:40, logvar -> lanes 40:60, all other lanes zero.
    """
    w1, b1, wm, bm, ws, bs = params
    b1 = jnp.asarray(b1).reshape(1, -1)
    bm = jnp.asarray(bm).reshape(1, -1)
    bs = jnp.asarray(bs).reshape(1, -1)

    w1p = jnp.zeros((IN_FEATURES, HIDDEN_PAD), jnp.float32).at[:, :HIDDEN].set(w1)
    b1p = jnp.zeros((1, HIDDEN_PAD), jnp.float32).at[:, :HIDDEN].set(b1)

    whp = jnp.zeros((HIDDEN_PAD, OUT_PAD), jnp.float32)
    whp = whp.at[:HIDDEN, LATENT:2 * LATENT].set(wm)
    whp = whp.at[:HIDDEN, 2 * LATENT:3 * LATENT].set(ws)
    bhp = jnp.zeros((1, OUT_PAD), jnp.float32)
    bhp = bhp.at[:, LATENT:2 * LATENT].set(bm)
    bhp = bhp.at[:, 2 * LATENT:3 * LATENT].set(bs)

    return (w1p.astype(jnp.bfloat16), b1p, whp.astype(jnp.bfloat16), bhp)


def encoder_forward(inputs, sample, params, *,
                    batch_tile=DEFAULT_BATCH_TILE, out_dtype=jnp.float32):
    """inputs: (B, 1, 28, 28) or (B, 784) in f32 or bf16; sample: (B, 20).

    Returns (sample, mean, logvar), each (B, 20) in `out_dtype`.
    bf16 inputs are consumed directly (halves the dominant HBM stream on
    v6e/v7x); no wrapper-side dtype cast of x is ever introduced.
    """
    x = inputs.reshape(-1, IN_FEATURES)               # torch: inputs.view(-1, 28*28)
    noise = sample.astype(jnp.float32)
    B = x.shape[0]

    w1p, b1p, whp, bhp = pack_params(params)

    # Batch tiling (avoids padding the big x stream whenever possible).
    tb, b_pad = _choose_batch_tile(B, batch_tile)
    if b_pad != B:
        x = jnp.pad(x, ((0, b_pad - B), (0, 0)))
        noise = jnp.pad(noise, ((0, b_pad - B), (0, 0)))

    x_bytes = int(jnp.dtype(x.dtype).itemsize)
    out_bytes = int(jnp.dtype(out_dtype).itemsize)
    cost = pl.CostEstimate(
        flops=2 * b_pad * (IN_FEATURES * HIDDEN_PAD + HIDDEN_PAD * OUT_PAD),
        transcendentals=b_pad * LATENT,
        bytes_accessed=(b_pad * (IN_FEATURES * x_bytes + LATENT * 4 + OUT_PAD * out_bytes)
                        + IN_FEATURES * HIDDEN_PAD * 2 + HIDDEN_PAD * 4
                        + HIDDEN_PAD * OUT_PAD * 2 + OUT_PAD * 4),
    )

    out = pl.pallas_call(
        encoder_kernel,
        out_shape=jax.ShapeDtypeStruct((b_pad, OUT_PAD), out_dtype),
        grid=(b_pad // tb,),
        in_specs=[
            # streamed per-tile inputs (double-buffered by the auto-pipeliner)
            pl.BlockSpec((tb, IN_FEATURES), lambda i: (i, 0)),     # x
            pl.BlockSpec((tb, LATENT), lambda i: (i, 0)),          # noise
            # weights / biases: constant block index -> VMEM-resident across tiles
            pl.BlockSpec((IN_FEATURES, HIDDEN_PAD), lambda i: (0, 0)),
            pl.BlockSpec((1, HIDDEN_PAD), lambda i: (0, 0)),
            pl.BlockSpec((HIDDEN_PAD, OUT_PAD), lambda i: (0, 0)),
            pl.BlockSpec((1, OUT_PAD), lambda i: (0, 0)),
        ],
        out_specs=pl.BlockSpec((tb, OUT_PAD), lambda i: (i, 0)),
        compiler_params=pltpu.CompilerParams(
            # batch tiles are independent -> shard across TCs on v7x
            dimension_semantics=("parallel",),
            # headroom for batch_tile up to 2048 (covers v5e's 16 MiB scoped
            # default; stays well under v7x's 64 MiB physical VMEM)
            vmem_limit_bytes=40 << 20,
        ),
        cost_estimate=cost,
    )(x, noise, w1p, b1p, whp, bhp)

    # Free layout plumbing: slice the lane-dense slab back to (B, 20) pieces.
    sample_out = out[:B, 0:LATENT]
    mean = out[:B, LATENT:2 * LATENT]
    logvar = out[:B, 2 * LATENT:3 * LATENT]
    return sample_out, mean, logvar


def init_params(key):
    """Deterministic init mimicking torch.nn.Linear default (uniform +/- 1/sqrt(fan_in)).
    Weights stored as (in_features, out_features) so the kernel does x @ W + b."""
    ks = jax.random.split(key, 6)

    def linear(kw, kb, fan_in, fan_out):
        bound = 1.0 / (fan_in ** 0.5)
        w = jax.random.uniform(kw, (fan_in, fan_out), jnp.float32, -bound, bound)
        b = jax.random.uniform(kb, (1, fan_out), jnp.float32, -bound, bound)
        return w, b

    w1, b1 = linear(ks[0], ks[1], IN_FEATURES, HIDDEN)
    wm, bm = linear(ks[2], ks[3], HIDDEN, LATENT)
    ws, bs = linear(ks[4], ks[5], HIDDEN, LATENT)
    return (w1, b1, wm, bm, ws, bs)


if __name__ == "__main__":
    key = jax.random.PRNGKey(0)
    k_in, k_noise, k_param = jax.random.split(key, 3)

    B = 8
    inputs = jax.random.normal(k_in, (B, 1, 28, 28), jnp.float32)
    sample = jax.random.normal(k_noise, (B, LATENT), jnp.float32)
    params = init_params(k_param)

    out_sample, out_mean, out_logvar = encoder_forward(inputs, sample, params)
    jax.block_until_ready((out_sample, out_mean, out_logvar))

    # Pure-JAX reference using the same bf16-weight / f32-accumulate recipe.
    x = inputs.reshape(-1, IN_FEATURES)
    w1, b1, wm, bm, ws, bs = params
    h = jnp.maximum(
        jnp.dot(x.astype(jnp.bfloat16), w1.astype(jnp.bfloat16),
                preferred_element_type=jnp.float32) + b1.reshape(1, -1), 0.0)
    hb = h.astype(jnp.bfloat16)
    mean_ref = jnp.dot(hb, wm.astype(jnp.bfloat16),
                       preferred_element_type=jnp.float32) + bm.reshape(1, -1)
    logvar_ref = jnp.dot(hb, ws.astype(jnp.bfloat16),
                         preferred_element_type=jnp.float32) + bs.reshape(1, -1)
    sample_ref = sample * jnp.exp(0.5 * logvar_ref) + mean_ref

    assert jnp.allclose(out_mean, mean_ref, atol=2e-2, rtol=2e-2)
    assert jnp.allclose(out_logvar, logvar_ref, atol=2e-2, rtol=2e-2)
    assert jnp.allclose(out_sample, sample_ref, atol=2e-2, rtol=2e-2)

    print("KERNEL_OK")
</pallas_src>

<mosaic_0001>
module attributes {stable_mosaic.version = 11 : i64} {
  func.func @encoder_kernel(%arg0: i32, %arg1: memref<8x784xf32, #tpu.memory_space<vmem>>, %arg2: memref<8x20xf32, #tpu.memory_space<vmem>>, %arg3: memref<784x512xbf16, #tpu.memory_space<vmem>>, %arg4: memref<1x512xf32, #tpu.memory_space<vmem>>, %arg5: memref<512x128xbf16, #tpu.memory_space<vmem>>, %arg6: memref<1x128xf32, #tpu.memory_space<vmem>>, %arg7: memref<8x128xf32, #tpu.memory_space<vmem>>) attributes {dimension_semantics = [#tpu.dimension_semantics<parallel>], iteration_bounds = array<i64: 1>, scalar_prefetch = 0 : i64, scratch_operands = 0 : i64, tpu.core_type = #tpu.core_type<tc>, window_params = [{transform_indices = @transform_0, window_bounds = array<i64: 8, 784>}, {transform_indices = @transform_1, window_bounds = array<i64: 8, 20>}, {pipeline_mode = #tpu.pipeline_mode<synchronous>, transform_indices = @transform_2, window_bounds = array<i64: 784, 512>}, {pipeline_mode = #tpu.pipeline_mode<synchronous>, transform_indices = @transform_3, window_bounds = array<i64: 1, 512>}, {pipeline_mode = #tpu.pipeline_mode<synchronous>, transform_indices = @transform_4, window_bounds = array<i64: 512, 128>}, {pipeline_mode = #tpu.pipeline_mode<synchronous>, transform_indices = @transform_5, window_bounds = array<i64: 1, 128>}, {transform_indices = @transform_6, window_bounds = array<i64: 8, 128>}]} {
    %c0 = arith.constant 0 : index
    %c0_0 = arith.constant 0 : index
    %0 = vector.load %arg1[%c0, %c0_0] : memref<8x784xf32, #tpu.memory_space<vmem>>, vector<8x784xf32>
    %1 = arith.truncf %0 : vector<8x784xf32> to vector<8x784xbf16>
    %c0_1 = arith.constant 0 : index
    %c0_2 = arith.constant 0 : index
    %2 = vector.load %arg3[%c0_1, %c0_2] : memref<784x512xbf16, #tpu.memory_space<vmem>>, vector<784x512xbf16>
    %cst = arith.constant dense<0.000000e+00> : vector<8x512xf32>
    %3 = tpu.matmul %1, %2, %cst {dimension_numbers = #tpu.dot_dimension_numbers<[1], [0], [0], [1], [0, 0, 1, 1], [], []>} : vector<8x784xbf16>, vector<784x512xbf16>, vector<8x512xf32> -> vector<8x512xf32>
    %c0_3 = arith.constant 0 : index
    %c0_4 = arith.constant 0 : index
    %4 = vector.load %arg4[%c0_3, %c0_4] : memref<1x512xf32, #tpu.memory_space<vmem>>, vector<1x512xf32>
    %5 = vector.broadcast %4 : vector<1x512xf32> to vector<8x512xf32>
    %6 = arith.addf %3, %5 : vector<8x512xf32>
    %cst_5 = arith.constant 0.000000e+00 : f32
    %7 = vector.broadcast %cst_5 : f32 to vector<8x512xf32>
    %8 = arith.maximumf %6, %7 : vector<8x512xf32>
    %9 = arith.truncf %8 : vector<8x512xf32> to vector<8x512xbf16>
    %c0_6 = arith.constant 0 : index
    %c0_7 = arith.constant 0 : index
    %10 = vector.load %arg5[%c0_6, %c0_7] : memref<512x128xbf16, #tpu.memory_space<vmem>>, vector<512x128xbf16>
    %cst_8 = arith.constant dense<0.000000e+00> : vector<8x128xf32>
    %11 = tpu.matmul %9, %10, %cst_8 {dimension_numbers = #tpu.dot_dimension_numbers<[1], [0], [0], [1], [0, 0, 1, 1], [], []>} : vector<8x512xbf16>, vector<512x128xbf16>, vector<8x128xf32> -> vector<8x128xf32>
    %c0_9 = arith.constant 0 : index
    %c0_10 = arith.constant 0 : index
    %12 = vector.load %arg6[%c0_9, %c0_10] : memref<1x128xf32, #tpu.memory_space<vmem>>, vector<1x128xf32>
    %13 = vector.broadcast %12 : vector<1x128xf32> to vector<8x128xf32>
    %14 = arith.addf %11, %13 : vector<8x128xf32>
    %15 = vector.extract_strided_slice %14 {offsets = [0, 20], sizes = [8, 20], strides = [1, 1]} : vector<8x128xf32> to vector<8x20xf32>
    %16 = vector.extract_strided_slice %14 {offsets = [0, 40], sizes = [8, 20], strides = [1, 1]} : vector<8x128xf32> to vector<8x20xf32>
    %cst_11 = arith.constant 5.000000e-01 : f32
    %17 = vector.broadcast %cst_11 : f32 to vector<8x20xf32>
    %18 = arith.mulf %17, %16 : vector<8x20xf32>
    %19 = math.exp %18 : vector<8x20xf32>
    %c0_12 = arith.constant 0 : index
    %c0_13 = arith.constant 0 : index
    %20 = vector.load %arg2[%c0_12, %c0_13] : memref<8x20xf32, #tpu.memory_space<vmem>>, vector<8x20xf32>
    %21 = arith.mulf %20, %19 : vector<8x20xf32>
    %22 = arith.addf %21, %15 : vector<8x20xf32>
    %c0_14 = arith.constant 0 : index
    %c0_15 = arith.constant 0 : index
    %23 = vector.load %arg7[%c0_14, %c0_15] : memref<8x128xf32, #tpu.memory_space<vmem>>, vector<8x128xf32>
    tpu.vector_store %arg7[%c0_14, %c0_15], %14 {strides = array<i32>} : memref<8x128xf32, #tpu.memory_space<vmem>>, vector<8x128xf32>,
    %c0_16 = arith.constant 0 : index
    %c0_17 = arith.constant 0 : index
    %24 = vector.load %arg7[%c0_16, %c0_17] : memref<8x128xf32, #tpu.memory_space<vmem>>, vector<8x20xf32>
    tpu.vector_store %arg7[%c0_16, %c0_17], %22 {strides = array<i32>} : memref<8x128xf32, #tpu.memory_space<vmem>>, vector<8x20xf32>,
    return
  }
  func.func @transform_0(%arg0: i32) -> (i32, i32) {
    %c0_i32 = arith.constant 0 : i32
    %c0_i32_0 = arith.constant 0 : i32
    return %arg0, %c0_i32 : i32, i32
  }
  func.func @transform_1(%arg0: i32) -> (i32, i32) {
    %c0_i32 = arith.constant 0 : i32
    %c0_i32_0 = arith.constant 0 : i32
    return %arg0, %c0_i32 : i32, i32
  }
  func.func @transform_2(%arg0: i32) -> (i32, i32) {
    %c0_i32 = arith.constant 0 : i32
    %c0_i32_0 = arith.constant 0 : i32
    %c0_i32_1 = arith.constant 0 : i32
    return %c0_i32, %c0_i32_0 : i32, i32
  }
  func.func @transform_3(%arg0: i32) -> (i32, i32) {
    %c0_i32 = arith.constant 0 : i32
    %c0_i32_0 = arith.constant 0 : i32
    %c0_i32_1 = arith.constant 0 : i32
    return %c0_i32, %c0_i32_0 : i32, i32
  }
  func.func @transform_4(%arg0: i32) -> (i32, i32) {
    %c0_i32 = arith.constant 0 : i32
    %c0_i32_0 = arith.constant 0 : i32
    %c0_i32_1 = arith.constant 0 : i32
    return %c0_i32, %c0_i32_0 : i32, i32
  }
  func.func @transform_5(%arg0: i32) -> (i32, i32) {
    %c0_i32 = arith.constant 0 : i32
    %c0_i32_0 = arith.constant 0 : i32
    %c0_i32_1 = arith.constant 0 : i32
    return %c0_i32, %c0_i32_0 : i32, i32
  }
  func.func @transform_6(%arg0: i32) -> (i32, i32) {
    %c0_i32 = arith.constant 0 : i32
    %c0_i32_0 = arith.constant 0 : i32
    return %arg0, %c0_i32 : i32, i32
  }
}

</mosaic_0001>

<bundles_post_ra>
// kernel: tpu_custom_call.1
= control target key start
LH: loop header
LB: loop body
LE: loop exit
PB: predicated region body
PF: predicated region fallthrough
CT: control target
= control target key end

     0   :  { %11 = vsyncpa [#allocation3], 0  ;;  %s2828_s0 = inlined_call_operand.hbm [shape: f32[8,784], index: 0, kind: input, shape index: {}]   ;;  %s2829_s1 = inlined_call_operand.hbm [shape: f32[8,20], index: 1, kind: input, shape index: {}]   ;;  %s2830_s2 = inlined_call_operand.hbm [shape: bf16[784,512], index: 2, kind: input, shape index: {}]   ;;  %s2831_s3 = inlined_call_operand.vmem [shape: f32[1,512], index: 3, kind: input, shape index: {}]   ;;  %s2832_s4 = inlined_call_operand.hbm [shape: bf16[512,128], index: 4, kind: input, shape index: {}]   ;;  %s2833_s5 = inlined_call_operand.vmem [shape: f32[1,128], index: 5, kind: input, shape index: {}]   ;;  %s2834_s6 = inlined_call_operand.hbm [shape: f32[8,128], index: 6, kind: output, shape index: {}]  }
   0x1   :  { %12 = vsyncpa [#allocation6], 0 }
   0x2   :  { %13 = vsyncpa [#allocation9], 0 }
   0x3   :  { %14 = vsyncpa [#allocation4], 0  ;;  %s2728_s21 = smov [#allocation5]   ;;  %s2729_s23 = smov [#allocation2]  }
   0x4   :  { %s31_s22 = sshll.u32 %s2728_s21, 4  ;;  %s21_s24 = sshll.u32 %s2729_s23, 4  ;;  %s32_s22 = int_to_ptr.vmem [resolvable:$true] %s31_s22  ;;  %s22_s24 = int_to_ptr.vmem [resolvable:$true] %s21_s24 }
   0x5   :  { %s2628_s25 = scalar_lea.vmem %s32_s22, 128  ;;  %p2633_p1 = scmp.lt.s32.totalorder %s32_s22, %s32_s22 }
   0x6   :  { %p2629_p0 = scmp.ne.s32.totalorder %s32_s22, %s2628_s25  ;;  %p2634_p2 = scmp.lt.s32.totalorder %s2628_s25, %s2628_s25 }
   0x8   :  { %p2635_p3 = por %p2634_p2, %p2633_p1 }
   0xa   :  { %p2636_p4 = pnand %p2635_p3, %p2629_p0 }
   0xc   :  { %2639 = shalt.err (!%p2636_p4)
}
   0xd   :  { %34 = dma.hbm_to_vmem [thread:$0]  %s2829_s1, 128, %s32_s22, [#allocation6]  }
   0xe   :  { %s2648_s28 = scalar_lea.vmem %s22_s24, 896  ;;  %p2653_p6 = scmp.lt.s32.totalorder %s22_s24, %s22_s24 }
   0xf   :  { %p2649_p5 = scmp.ne.s32.totalorder %s22_s24, %s2648_s28  ;;  %p2654_p7 = scmp.lt.s32.totalorder %s2648_s28, %s2648_s28 }
  0x11   :  { %p2655_p8 = por %p2654_p7, %p2653_p6 }
  0x13   :  { %p2656_p9 = pnand %p2655_p8, %p2649_p5 }
  0x15   :  { %2659 = shalt.err (!%p2656_p9)
}
  0x16   :  { %24 = dma.hbm_to_vmem [thread:$0]  %s2828_s0, 896, %s22_s24, [#allocation3]  }
  0x17   :  { %s2730_s7 = smov [#allocation7]  }
  0x18   :  { %s40_s8 = sshll.u32 %s2730_s7, 4  ;;  %s41_s8 = int_to_ptr.vmem [resolvable:$true] %s40_s8 }
  0x19   :  { %s2668_s9 = scalar_lea.vmem %s41_s8, 25088  ;;  %p2673_p11 = scmp.lt.s32.totalorder %s41_s8, %s41_s8 }
  0x1a   :  { %p2669_p10 = scmp.ne.s32.totalorder %s41_s8, %s2668_s9  ;;  %p2674_p12 = scmp.lt.s32.totalorder %s2668_s9, %s2668_s9 }
  0x1c   :  { %p2675_p13 = por %p2674_p12, %p2673_p11 }
  0x1e   :  { %p2676_p0 = pnand %p2675_p13, %p2669_p10 }
  0x20   :  { %2679 = shalt.err (!%p2676_p0)
}
  0x21   :  { %s2731_s1 = smov 256   ;;  %s2732_s10 = smov 16  }
  0x22   :  { %46 = dma.hbm_to_vmem [thread:$0]  %s2830_s2, 25088, %s41_s8, [#allocation6], %s2731_s1, %s2731_s1, %s2732_s10  }
  0x23   :  { %s2733_s13 = smov [#allocation8]  }
  0x24   :  { %s54_s14 = sshll.u32 %s2733_s13, 4  ;;  %s55_s14 = int_to_ptr.vmem [resolvable:$true] %s54_s14 }
  0x25   :  { %s2688_s0 = scalar_lea.vmem %s55_s14, 4096  ;;  %p2693_p2 = scmp.lt.s32.totalorder %s55_s14, %s55_s14 }
  0x26   :  { %p2689_p1 = scmp.ne.s32.totalorder %s55_s14, %s2688_s0  ;;  %p2694_p3 = scmp.lt.s32.totalorder %s2688_s0, %s2688_s0 }
  0x28   :  { %p2695_p4 = por %p2694_p3, %p2693_p2 }
  0x2a   :  { %p2696_p5 = pnand %p2695_p4, %p2689_p1 }
  0x2c   :  { %2699 = shalt.err (!%p2696_p5)
}
  0x2d   :  { %s2734_s15 = smov 64   ;;  %s2735_s16 = smov 4  }
  0x2e   :  { %60 = dma.hbm_to_vmem [thread:$0]  %s2832_s4, 4096, %s55_s14, [#allocation9], %s2734_s15, %s2734_s15, %s2735_s16  }
  0x2f   :  { %2720 = dma.done.wait [#allocation3], 896  }
  0x30   :  { %2721 = vsyncadd [#allocation3], 4294966400 }
  0x31   :  { %2722 = dma.done.wait [#allocation6], 25216  }
  0x32   :  { %2723 = vsyncadd [#allocation6], 4294942080 }
  0x33   :  { %2724 = dma.done.wait [#allocation9], 4096  }
  0x34   :  { %2725 = vsyncadd [#allocation9], 4294963200  ;;  %v2292_v0 = vld [vmem:[#allocation7 + $0xe4] ss:$16 sps:$4 sm:$0xff]   ;;  %v2296_v2 = vld [vmem:[#allocation7 + $0xe0] ss:$16 sps:$4 sm:$0xff]  }
  0x35   :  { %v2294_v1 = vld [vmem:[#allocation7 + $0x2e4] ss:$16 sps:$4 sm:$0xff]   ;;  %1292 = vmatprep.subr.bf16.mxu0 %v2292_v0  ;;  %v2297_v3 = vld [vmem:[#allocation7 + $0x2e0] ss:$16 sps:$4 sm:$0xff]   ;;  %v77_v46 = vld [vmem:[#allocation2 + $0x8] sm:$0xff]  ;;  %vm1288_vm0 = vcmask 130048  }
  0x36   :  { %1333 = vmatprep.subr.bf16.mxu1 %v2294_v1  ;;  %v2298_v4 = vld [vmem:[#allocation7 + $0xc4] ss:$16 sps:$4 sm:$0xff]   ;;  %1293 = vmatpush1.bf16.msra.mxu0 %v2296_v2  ;;  %v2302_v6 = vld [vmem:[#allocation7 + $0xc0] ss:$16 sps:$4 sm:$0xff]   ;;  %v2787_v49 = vpack.c.bf16 %v77_v46, %v77_v46  ;;  %v79_v50 = vld [vmem:[#allocation2 + $0x18] sm:$0xff]  ;;  %s2737_s20 = smov 88  }
  0x37   :  { %1334 = vmatpush1.bf16.msra.mxu1 %v2297_v3  ;;  %v2300_v5 = vld [vmem:[#allocation7 + $0x2c4] ss:$16 sps:$4 sm:$0xff]   ;;  %1294 = vmatprep.subr.bf16.mxu0 %v2298_v4  ;;  %v2303_v7 = vld [vmem:[#allocation7 + $0x2c0] ss:$16 sps:$4 sm:$0xff]   ;;  %v2789_v52 = vpack.c.bf16 %v79_v50, %v79_v50  ;;  %s2738_s21 = smov 108   ;;  %s2739_s22 = smov [#allocation10]  }
  0x38   :  { %1335 = vmatprep.subr.bf16.mxu1 %v2300_v5  ;;  %v2304_v8 = vld [vmem:[#allocation7 + $0xa4] ss:$16 sps:$4 sm:$0xff]   ;;  %v2308_v10 = vld [vmem:[#allocation7 + $0xa0] ss:$16 sps:$4 sm:$0xff]   ;;  %1324 = vmatprep.mubr.bf16.mxu0 %v2787_v49  ;;  %vm1986_vm1 = vcmask 162816  }
  0x39   :  { %v2306_v9 = vld [vmem:[#allocation7 + $0x2a4] ss:$16 sps:$4 sm:$0xff]   ;;  %v2309_v11 = vld [vmem:[#allocation7 + $0x2a0] ss:$16 sps:$4 sm:$0xff]   ;;  %1365 = vmatprep.mubr.bf16.mxu1 %v2789_v52 }
  0x3a   :  { %1295 = vmatpush1.bf16.msra.mxu0 %v2302_v6  ;;  %v2310_v12 = vld [vmem:[#allocation7 + $0x84] ss:$16 sps:$4 sm:$0xff]   ;;  %v2314_v14 = vld [vmem:[#allocation7 + $0x80] ss:$16 sps:$4 sm:$0xff]  }
  0x3b   :  { %1336 = vmatpush1.bf16.msra.mxu1 %v2303_v7  ;;  %1296 = vmatprep.subr.bf16.mxu0 %v2304_v8  ;;  %v2312_v13 = vld [vmem:[#allocation7 + $0x284] ss:$16 sps:$4 sm:$0xff]   ;;  %v2315_v15 = vld [vmem:[#allocation7 + $0x280] ss:$16 sps:$4 sm:$0xff]  }
  0x3c   :  { %1337 = vmatprep.subr.bf16.mxu1 %v2306_v9  ;;  %v2316_v16 = vld [vmem:[#allocation7 + $0x64] ss:$16 sps:$4 sm:$0xff]   ;;  %v2320_v18 = vld [vmem:[#allocation7 + $0x60] ss:$16 sps:$4 sm:$0xff]  }
  0x3d   :  { %v2318_v17 = vld [vmem:[#allocation7 + $0x264] ss:$16 sps:$4 sm:$0xff]   ;;  %v2321_v19 = vld [vmem:[#allocation7 + $0x260] ss:$16 sps:$4 sm:$0xff]  }
  0x3e   :  { %1297 = vmatpush1.bf16.msra.mxu0 %v2308_v10  ;;  %v2322_v20 = vld [vmem:[#allocation7 + $0x44] ss:$16 sps:$4 sm:$0xff]   ;;  %v2326_v22 = vld [vmem:[#allocation7 + $0x40] ss:$16 sps:$4 sm:$0xff]  }
  0x3f   :  { %1338 = vmatpush1.bf16.msra.mxu1 %v2309_v11  ;;  %1298 = vmatprep.subr.bf16.mxu0 %v2310_v12  ;;  %v2324_v21 = vld [vmem:[#allocation7 + $0x244] ss:$16 sps:$4 sm:$0xff]   ;;  %v2327_v23 = vld [vmem:[#allocation7 + $0x240] ss:$16 sps:$4 sm:$0xff]  }
  0x40   :  { %1339 = vmatprep.subr.bf16.mxu1 %v2312_v13  ;;  %v2328_v24 = vld [vmem:[#allocation7 + $0x24] ss:$16 sps:$4 sm:$0xff]   ;;  %v2332_v26 = vld [vmem:[#allocation7 + $0x20] ss:$16 sps:$4 sm:$0xff]   ;;  %v2399_v13 = vld [vmem:[#allocation7 + $0xec] ss:$16 sps:$4 sm:$0xff]  }
  0x41   :  { %v2330_v25 = vld [vmem:[#allocation7 + $0x224] ss:$16 sps:$4 sm:$0xff]   ;;  %v2333_v27 = vld [vmem:[#allocation7 + $0x220] ss:$16 sps:$4 sm:$0xff]  }
  0x42   :  { %1299 = vmatpush1.bf16.msra.mxu0 %v2314_v14  ;;  %v2334_v28 = vld [vmem:[#allocation7 + $0x4] ss:$16 sps:$4 sm:$0xff]   ;;  %v2338_v30 = vld [vmem:[#allocation7] ss:$16 sps:$4 sm:$0xff]  }
  0x43   :  { %1340 = vmatpush1.bf16.msra.mxu1 %v2315_v15  ;;  %1300 = vmatprep.subr.bf16.mxu0 %v2316_v16  ;;  %v2336_v29 = vld [vmem:[#allocation7 + $0x204] ss:$16 sps:$4 sm:$0xff]   ;;  %v2339_v31 = vld [vmem:[#allocation7 + $0x200] ss:$16 sps:$4 sm:$0xff]   ;;  %v2736_v16 = vmov 0  }
  0x44   :  { %1341 = vmatprep.subr.bf16.mxu1 %v2318_v17  ;;  %v2340_v32 = vld [vmem:[#allocation7 + $0x1e4] ss:$16 sps:$4 sm:$0xff]   ;;  %v2344_v34 = vld [vmem:[#allocation7 + $0x1e0] ss:$16 sps:$4 sm:$0xff]  }
  0x45   :  { %v2342_v33 = vld [vmem:[#allocation7 + $0x3e4] ss:$16 sps:$4 sm:$0xff]   ;;  %v2345_v35 = vld [vmem:[#allocation7 + $0x3e0] ss:$16 sps:$4 sm:$0xff]  }
  0x46   :  { %1301 = vmatpush1.bf16.msra.mxu0 %v2320_v18  ;;  %v2346_v36 = vld [vmem:[#allocation7 + $0x1c4] ss:$16 sps:$4 sm:$0xff]   ;;  %v2350_v38 = vld [vmem:[#allocation7 + $0x1c0] ss:$16 sps:$4 sm:$0xff]   ;;  %v2397_v18 = vld [vmem:[#allocation7 + $0xe8] ss:$16 sps:$4 sm:$0xff]  }
  0x47   :  { %1342 = vmatpush1.bf16.msra.mxu1 %v2321_v19  ;;  %1302 = vmatprep.subr.bf16.mxu0 %v2322_v20  ;;  %v2348_v37 = vld [vmem:[#allocation7 + $0x3c4] ss:$16 sps:$4 sm:$0xff]   ;;  %v2351_v39 = vld [vmem:[#allocation7 + $0x3c0] ss:$16 sps:$4 sm:$0xff]  }
  0x48   :  { %1343 = vmatprep.subr.bf16.mxu1 %v2324_v21  ;;  %v2352_v40 = vld [vmem:[#allocation7 + $0x1a4] ss:$16 sps:$4 sm:$0xff]   ;;  %v2356_v42 = vld [vmem:[#allocation7 + $0x1a0] ss:$16 sps:$4 sm:$0xff]   ;;  %v2405_v21 = vld [vmem:[#allocation7 + $0xcc] ss:$16 sps:$4 sm:$0xff]  }
  0x49   :  { %v2354_v41 = vld [vmem:[#allocation7 + $0x3a4] ss:$16 sps:$4 sm:$0xff]   ;;  %v2357_v43 = vld [vmem:[#allocation7 + $0x3a0] ss:$16 sps:$4 sm:$0xff]  }
  0x4a   :  { %1303 = vmatpush1.bf16.msra.mxu0 %v2326_v22  ;;  %v2358_v44 = vld [vmem:[#allocation7 + $0x184] ss:$16 sps:$4 sm:$0xff]   ;;  %v2362_v47 = vld [vmem:[#allocation7 + $0x180] ss:$16 sps:$4 sm:$0xff]  }
  0x4b   :  { %1344 = vmatpush1.bf16.msra.mxu1 %v2327_v23  ;;  %1304 = vmatprep.subr.bf16.mxu0 %v2328_v24  ;;  %v2360_v45 = vld [vmem:[#allocation7 + $0x384] ss:$16 sps:$4 sm:$0xff]   ;;  %v2363_v48 = vld [vmem:[#allocation7 + $0x380] ss:$16 sps:$4 sm:$0xff]   ;;  %v2403_v23 = vld [vmem:[#allocation7 + $0xc8] ss:$16 sps:$4 sm:$0xff]  }
  0x4c   :  { %1345 = vmatprep.subr.bf16.mxu1 %v2330_v25  ;;  %v2364_v51 = vld [vmem:[#allocation7 + $0x164] ss:$16 sps:$4 sm:$0xff]   ;;  %v2368_v54 = vld [vmem:[#allocation7 + $0x160] ss:$16 sps:$4 sm:$0xff]   ;;  %v2411_v25 = vld [vmem:[#allocation7 + $0xac] ss:$16 sps:$4 sm:$0xff]  }
  0x4d   :  { %v2366_v53 = vld [vmem:[#allocation7 + $0x364] ss:$16 sps:$4 sm:$0xff]   ;;  %v2369_v55 = vld [vmem:[#allocation7 + $0x360] ss:$16 sps:$4 sm:$0xff]  }
  0x4e   :  { %1305 = vmatpush1.bf16.msra.mxu0 %v2332_v26  ;;  %v2370_v56 = vld [vmem:[#allocation7 + $0x144] ss:$16 sps:$4 sm:$0xff]   ;;  %v2374_v58 = vld [vmem:[#allocation7 + $0x140] ss:$16 sps:$4 sm:$0xff]  }
  0x4f   :  { %1346 = vmatpush1.bf16.msra.mxu1 %v2333_v27  ;;  %1306 = vmatprep.subr.bf16.mxu0 %v2334_v28  ;;  %v2372_v57 = vld [vmem:[#allocation7 + $0x344] ss:$16 sps:$4 sm:$0xff]   ;;  %v2375_v59 = vld [vmem:[#allocation7 + $0x340] ss:$16 sps:$4 sm:$0xff]   ;;  %v2409_v27 = vld [vmem:[#allocation7 + $0xa8] ss:$16 sps:$4 sm:$0xff]  }
  0x50   :  { %1347 = vmatprep.subr.bf16.mxu1 %v2336_v29  ;;  %v2376_v60 = vld [vmem:[#allocation7 + $0x124] ss:$16 sps:$4 sm:$0xff]   ;;  %v2380_v62 = vld [vmem:[#allocation7 + $0x120] ss:$16 sps:$4 sm:$0xff]   ;;  %v2417_v29 = vld [vmem:[#allocation7 + $0x8c] ss:$16 sps:$4 sm:$0xff]  }
  0x51   :  { %v2378_v61 = vld [vmem:[#allocation7 + $0x324] ss:$16 sps:$4 sm:$0xff]   ;;  %v2381_v63 = vld [vmem:[#allocation7 + $0x320] ss:$16 sps:$4 sm:$0xff]  }
  0x52   :  { %1307 = vmatpush1.bf16.msra.mxu0 %v2338_v30  ;;  %v2382_v0 = vld [vmem:[#allocation7 + $0x104] ss:$16 sps:$4 sm:$0xff]   ;;  %v2386_v2 = vld [vmem:[#allocation7 + $0x100] ss:$16 sps:$4 sm:$0xff]  }
  0x53   :  { %1348 = vmatpush1.bf16.msra.mxu1 %v2339_v31  ;;  %1308 = vmatprep.subr.bf16.mxu0 %v2340_v32  ;;  %v2384_v1 = vld [vmem:[#allocation7 + $0x304] ss:$16 sps:$4 sm:$0xff]   ;;  %v2387_v3 = vld [vmem:[#allocation7 + $0x300] ss:$16 sps:$4 sm:$0xff]   ;;  %v2415_v31 = vld [vmem:[#allocation7 + $0x88] ss:$16 sps:$4 sm:$0xff]  }
  0x54   :  { %1349 = vmatprep.subr.bf16.mxu1 %v2342_v33  ;;  %v76_v4 = vld [vmem:[#allocation2] sm:$0xff]  ;;  %v78_v5 = vld [vmem:[#allocation2 + $0x10] sm:$0xff]  ;;  %v2423_v33 = vld [vmem:[#allocation7 + $0x6c] ss:$16 sps:$4 sm:$0xff]  }
  0x55   :  { %v2390_v6 = vld [vmem:[#allocation7 + $0x4e4] ss:$16 sps:$4 sm:$0xff]   ;;  %v2793_v8 = vpack.c.bf16 %v76_v4, %v76_v4  ;;  %v2795_v9 = vpack.c.bf16 %v78_v5, %v78_v5  ;;  %v2388_v10 = vld [vmem:[#allocation7 + $0x4e0] ss:$16 sps:$4 sm:$0xff]   ;;  %v2471_v4 = vld [vmem:[#allocation7 + $0x16c] ss:$16 sps:$4 sm:$0xff]  }
  0x56   :  { %1309 = vmatpush2.bf16.msra.mxu0 %v2344_v34  ;;  %v2393_v7 = vld [vmem:[#allocation7 + $0x604] ss:$16 sps:$4 sm:$0xff]   ;;  %v2391_v11 = vld [vmem:[#allocation7 + $0x600] ss:$16 sps:$4 sm:$0xff]  }
  0x57   :  { %1350 = vmatpush2.bf16.msra.mxu1 %v2345_v35  ;;  %1310 = vmatprep.subr.bf16.mxu0 %v2346_v36  ;;  %v2396_v12 = vld [vmem:[#allocation7 + $0x4c4] ss:$16 sps:$4 sm:$0xff]   ;;  %v2394_v14 = vld [vmem:[#allocation7 + $0x4c0] ss:$16 sps:$4 sm:$0xff]   ;;  %v81_v35 = vld [vmem:[#allocation2 + $0x28] sm:$0xff] }
  0x58   :  { %1351 = vmatprep.subr.bf16.mxu1 %v2348_v37  ;;  %v82_v15 = vld [vmem:[#allocation2 + $0x30] sm:$0xff]  ;;  %v2805_v36 = vpack.c.bf16 %v81_v35, %v81_v35  ;;  %v2421_v37 = vld [vmem:[#allocation7 + $0x68] ss:$16 sps:$4 sm:$0xff]   ;;  %v2510_v35 = vld [vmem:[#allocation7 + $0x26c] ss:$16 sps:$4 sm:$0xff]  }
  0x59   :  { %v2402_v17 = vld [vmem:[#allocation7 + $0x4a4] ss:$16 sps:$4 sm:$0xff]   ;;  %v2800_v19 = vpack.c.bf16 %v82_v15, %v82_v15  ;;  %v2400_v20 = vld [vmem:[#allocation7 + $0x4a0] ss:$16 sps:$4 sm:$0xff]  }
  0x5a   :  { %1311 = vmatpush2.bf16.msra.mxu0 %v2350_v38  ;;  %v2408_v22 = vld [vmem:[#allocation7 + $0x484] ss:$16 sps:$4 sm:$0xff]   ;;  %v2406_v24 = vld [vmem:[#allocation7 + $0x480] ss:$16 sps:$4 sm:$0xff]  }
  0x5b   :  { %1352 = vmatpush2.bf16.msra.mxu1 %v2351_v39  ;;  %1312 = vmatprep.subr.bf16.mxu0 %v2352_v40  ;;  %v2414_v26 = vld [vmem:[#allocation7 + $0x464] ss:$16 sps:$4 sm:$0xff]   ;;  %v2412_v28 = vld [vmem:[#allocation7 + $0x460] ss:$16 sps:$4 sm:$0xff]   ;;  %v2429_v39 = vld [vmem:[#allocation7 + $0x4c] ss:$16 sps:$4 sm:$0xff]  }
  0x5c   :  { %1353 = vmatprep.subr.bf16.mxu1 %v2354_v41  ;;  %v2420_v30 = vld [vmem:[#allocation7 + $0x444] ss:$16 sps:$4 sm:$0xff]   ;;  %v2418_v32 = vld [vmem:[#allocation7 + $0x440] ss:$16 sps:$4 sm:$0xff]   ;;  %v2427_v41 = vld [vmem:[#allocation7 + $0x48] ss:$16 sps:$4 sm:$0xff]  }
  0x5d   :  { %v2426_v34 = vld [vmem:[#allocation7 + $0x424] ss:$16 sps:$4 sm:$0xff]   ;;  %v2424_v38 = vld [vmem:[#allocation7 + $0x420] ss:$16 sps:$4 sm:$0xff]  }
  0x5e   :  { %1313 = vmatpush2.bf16.msra.mxu0 %v2356_v42  ;;  %v2432_v40 = vld [vmem:[#allocation7 + $0x404] ss:$16 sps:$4 sm:$0xff]   ;;  %v2430_v42 = vld [vmem:[#allocation7 + $0x400] ss:$16 sps:$4 sm:$0xff]  }
  0x5f   :  { %1354 = vmatpush2.bf16.msra.mxu1 %v2357_v43  ;;  %1314 = vmatprep.subr.bf16.mxu0 %v2358_v44  ;;  %v2435_v43 = vld [vmem:[#allocation7 + $0x2c] ss:$16 sps:$4 sm:$0xff]   ;;  %v2438_v44 = vld [vmem:[#allocation7 + $0x5e4] ss:$16 sps:$4 sm:$0xff]   ;;  %v2436_v46 = vld [vmem:[#allocation7 + $0x5e0] ss:$16 sps:$4 sm:$0xff]  }
  0x60   :  { %1355 = vmatprep.subr.bf16.mxu1 %v2360_v45  ;;  %v2433_v45 = vld [vmem:[#allocation7 + $0x28] ss:$16 sps:$4 sm:$0xff]   ;;  %v2442_v50 = vld [vmem:[#allocation7 + $0x5c0] ss:$16 sps:$4 sm:$0xff]   ;;  %v2474_v5 = vld [vmem:[#allocation7 + $0x524] ss:$16 sps:$4 sm:$0xff]  }
  0x61   :  { %v80_v15 = vld [vmem:[#allocation2 + $0x20] sm:$0xff] }
  0x62   :  { %1315 = vmatpush2.bf16.msra.mxu0 %v2362_v47  ;;  %v2441_v47 = vld [vmem:[#allocation7 + $0xc] ss:$16 sps:$4 sm:$0xff]  }
  0x63   :  { %1356 = vmatpush2.bf16.msra.mxu1 %v2363_v48  ;;  %1316 = vmatprep.subr.bf16.mxu0 %v2364_v51  ;;  %v2444_v48 = vld [vmem:[#allocation7 + $0x5c4] ss:$16 sps:$4 sm:$0xff]   ;;  %v2447_v51 = vld [vmem:[#allocation7 + $0x1ec] ss:$16 sps:$4 sm:$0xff]  }
  0x64   :  { %1357 = vmatprep.subr.bf16.mxu1 %v2366_v53  ;;  %v2450_v53 = vld [vmem:[#allocation7 + $0x5a4] ss:$16 sps:$4 sm:$0xff]  }
  0x66   :  { %1317 = vmatpush2.bf16.msra.mxu0 %v2368_v54  ;;  %v2445_v54 = vld [vmem:[#allocation7 + $0x1e8] ss:$16 sps:$4 sm:$0xff]  }
  0x67   :  { %1358 = vmatpush2.bf16.msra.mxu1 %v2369_v55  ;;  %1318 = vmatprep.subr.bf16.mxu0 %v2370_v56  ;;  %v2448_v55 = vld [vmem:[#allocation7 + $0x5a0] ss:$16 sps:$4 sm:$0xff]   ;;  %v2453_v56 = vld [vmem:[#allocation7 + $0x1cc] ss:$16 sps:$4 sm:$0xff]  }
  0x68   :  { %1359 = vmatprep.subr.bf16.mxu1 %v2372_v57  ;;  %v2456_v57 = vld [vmem:[#allocation7 + $0x584] ss:$16 sps:$4 sm:$0xff]  }
  0x6a   :  { %1319 = vmatpush2.bf16.msra.mxu0 %v2374_v58  ;;  %v2451_v58 = vld [vmem:[#allocation7 + $0x1c8] ss:$16 sps:$4 sm:$0xff]  }
  0x6b   :  { %1360 = vmatpush2.bf16.msra.mxu1 %v2375_v59  ;;  %1320 = vmatprep.subr.bf16.mxu0 %v2376_v60  ;;  %v2454_v59 = vld [vmem:[#allocation7 + $0x580] ss:$16 sps:$4 sm:$0xff]   ;;  %v2459_v60 = vld [vmem:[#allocation7 + $0x1ac] ss:$16 sps:$4 sm:$0xff]  }
  0x6c   :  { %1361 = vmatprep.subr.bf16.mxu1 %v2378_v61  ;;  %v2462_v61 = vld [vmem:[#allocation7 + $0x564] ss:$16 sps:$4 sm:$0xff]  }
  0x6e   :  { %1321 = vmatpush2.bf16.msra.mxu0 %v2380_v62  ;;  %v2457_v62 = vld [vmem:[#allocation7 + $0x1a8] ss:$16 sps:$4 sm:$0xff]  }
  0x6f   :  { %1362 = vmatpush2.bf16.msra.mxu1 %v2381_v63  ;;  %1322 = vmatprep.subr.bf16.mxu0 %v2382_v0  ;;  %v2460_v63 = vld [vmem:[#allocation7 + $0x560] ss:$16 sps:$4 sm:$0xff]   ;;  %v2465_v0 = vld [vmem:[#allocation7 + $0x18c] ss:$16 sps:$4 sm:$0xff]  }
  0x70   :  { %1363 = vmatprep.subr.bf16.mxu1 %v2384_v1  ;;  %v2468_v1 = vld [vmem:[#allocation7 + $0x544] ss:$16 sps:$4 sm:$0xff]  }
  0x72   :  { %1323 = vmatpush2.bf16.msra.mxu0 %v2386_v2  ;;  %v2463_v2 = vld [vmem:[#allocation7 + $0x188] ss:$16 sps:$4 sm:$0xff]  }
  0x73   :  { %1364 = vmatpush2.bf16.msra.mxu1 %v2387_v3  ;;  %1374 = vmatprep.subr.bf16.mxu0 %v2390_v6  ;;  %v2466_v3 = vld [vmem:[#allocation7 + $0x540] ss:$16 sps:$4 sm:$0xff]   ;;  %v2469_v6 = vld [vmem:[#allocation7 + $0x168] ss:$16 sps:$4 sm:$0xff]  }
  0x74   :  { %1429 = vmatprep.subr.bf16.mxu1 %v2393_v7  ;;  %v2472_v7 = vld [vmem:[#allocation7 + $0x520] ss:$16 sps:$4 sm:$0xff]  }
  0x75   :  { %1325 = vmatmul.mubr.bf16.vlgmr.msra.gmra.mxu0 %v2793_v8 }
  0x76   :  { %1366 = vmatmul.mubr.bf16.vlgmr.msra.gmra.mxu1 %v2795_v9  ;;  %1375 = vmatpush1.bf16.msra.mxu0 %v2388_v10  ;;  %v2477_v10 = vld [vmem:[#allocation7 + $0x14c] ss:$16 sps:$4 sm:$0xff]  }
  0x77   :  { %1430 = vmatpush1.bf16.msra.mxu1 %v2391_v11  ;;  %1376 = vmatprep.subr.bf16.mxu0 %v2396_v12  ;;  %v2480_v11 = vld [vmem:[#allocation7 + $0x504] ss:$16 sps:$4 sm:$0xff]   ;;  %v2475_v12 = vld [vmem:[#allocation7 + $0x148] ss:$16 sps:$4 sm:$0xff]  }
  0x78   :  { %1447 = vmatprep.mubr.bf16.mxu1 %v2736_v16  ;;  %1456 = vmatprep.subr.bf16.mxu1 %v2399_v13  ;;  %v2478_v13 = vld [vmem:[#allocation7 + $0x500] ss:$16 sps:$4 sm:$0xff]  }
  0x79   :  { %1406 = vmatprep.mubr.bf16.mxu0 %v2805_v36 }
  0x7a   :  { %1377 = vmatpush1.bf16.msra.mxu0 %v2394_v14  ;;  %v2483_v14 = vld [vmem:[#allocation7 + $0x12c] ss:$16 sps:$4 sm:$0xff]  }
  0x7b   :  { %1378 = vmatprep.subr.bf16.mxu0 %v2402_v17  ;;  %v2486_v17 = vld [vmem:[#allocation7 + $0x2ec] ss:$16 sps:$4 sm:$0xff]  }
  0x7e   :  { %2201 = vmatmul.mubr.msk.bf16.vlgmr.msra.gmra.mxu1 %vm1288_vm0, %v2800_v19  ;;  %1379 = vmatpush1.bf16.msra.mxu0 %v2400_v20  ;;  %v2808_v20 = vpack.c.bf16 %v80_v15, %v80_v15  ;;  %v2573_v15 = vld [vmem:[#allocation7 + $0x54c] ss:$16 sps:$4 sm:$0xff]  }
  0x7f   :  { %1457 = vmatpush1.bf16.msra.mxu1 %v2397_v18  ;;  %1380 = vmatprep.subr.bf16.mxu0 %v2408_v22  ;;  %v2481_v18 = vld [vmem:[#allocation7 + $0x128] ss:$16 sps:$4 sm:$0xff]   ;;  %v2489_v22 = vld [vmem:[#allocation7 + $0x10c] ss:$16 sps:$4 sm:$0xff]  }
  0x80   :  { %1458 = vmatprep.subr.bf16.mxu1 %v2405_v21  ;;  %1488 = vmatprep.mubr.bf16.mxu1 %v2787_v49  ;;  %v2439_v49 = vld [vmem:[#allocation7 + $0x8] ss:$16 sps:$4 sm:$0xff]  }
  0x81   :  { %v2484_v21 = vld [vmem:[#allocation7 + $0x2e8] ss:$16 sps:$4 sm:$0xff]  }
  0x82   :  { %1381 = vmatpush1.bf16.msra.mxu0 %v2406_v24  ;;  %v2487_v24 = vld [vmem:[#allocation7 + $0x108] ss:$16 sps:$4 sm:$0xff]  }
  0x83   :  { %1459 = vmatpush1.bf16.msra.mxu1 %v2403_v23  ;;  %1382 = vmatprep.subr.bf16.mxu0 %v2414_v26  ;;  %v2492_v23 = vld [vmem:[#allocation7 + $0x2cc] ss:$16 sps:$4 sm:$0xff]  }
  0x84   :  { %1460 = vmatprep.subr.bf16.mxu1 %v2411_v25  ;;  %v2490_v25 = vld [vmem:[#allocation7 + $0x2c8] ss:$16 sps:$4 sm:$0xff]   ;;  %v2495_v26 = vld [vmem:[#allocation7 + $0x4ec] ss:$16 sps:$4 sm:$0xff]  }
  0x86   :  { %1383 = vmatpush1.bf16.msra.mxu0 %v2412_v28  ;;  %v2493_v28 = vld [vmem:[#allocation7 + $0x4e8] ss:$16 sps:$4 sm:$0xff]  }
  0x87   :  { %1461 = vmatpush1.bf16.msra.mxu1 %v2409_v27  ;;  %1384 = vmatprep.subr.bf16.mxu0 %v2420_v30  ;;  %v2498_v27 = vld [vmem:[#allocation7 + $0x2ac] ss:$16 sps:$4 sm:$0xff]  }
  0x88   :  { %1462 = vmatprep.subr.bf16.mxu1 %v2417_v29  ;;  %v2496_v29 = vld [vmem:[#allocation7 + $0x2a8] ss:$16 sps:$4 sm:$0xff]   ;;  %v2501_v30 = vld [vmem:[#allocation7 + $0x4cc] ss:$16 sps:$4 sm:$0xff]  }
  0x8a   :  { %1385 = vmatpush1.bf16.msra.mxu0 %v2418_v32  ;;  %v2499_v32 = vld [vmem:[#allocation7 + $0x4c8] ss:$16 sps:$4 sm:$0xff]  }
  0x8b   :  { %1463 = vmatpush1.bf16.msra.mxu1 %v2415_v31  ;;  %1386 = vmatprep.subr.bf16.mxu0 %v2426_v34  ;;  %v2504_v31 = vld [vmem:[#allocation7 + $0x28c] ss:$16 sps:$4 sm:$0xff]  }
  0x8c   :  { %1464 = vmatprep.subr.bf16.mxu1 %v2423_v33  ;;  %v2502_v33 = vld [vmem:[#allocation7 + $0x288] ss:$16 sps:$4 sm:$0xff]   ;;  %v2507_v34 = vld [vmem:[#allocation7 + $0x4ac] ss:$16 sps:$4 sm:$0xff]  }
  0x8e   :  { %1387 = vmatpush1.bf16.msra.mxu0 %v2424_v38  ;;  %v2508_v38 = vld [vmem:[#allocation7 + $0x268] ss:$16 sps:$4 sm:$0xff]  }
  0x8f   :  { %1465 = vmatpush1.bf16.msra.mxu1 %v2421_v37  ;;  %1388 = vmatprep.subr.bf16.mxu0 %v2432_v40  ;;  %v2505_v37 = vld [vmem:[#allocation7 + $0x4a8] ss:$16 sps:$4 sm:$0xff]  }
  0x90   :  { %1466 = vmatprep.subr.bf16.mxu1 %v2429_v39  ;;  %v2516_v39 = vld [vmem:[#allocation7 + $0x24c] ss:$16 sps:$4 sm:$0xff]   ;;  %v2511_v40 = vld [vmem:[#allocation7 + $0x488] ss:$16 sps:$4 sm:$0xff]  }
  0x92   :  { %1389 = vmatpush1.bf16.msra.mxu0 %v2430_v42  ;;  %v2519_v42 = vld [vmem:[#allocation7 + $0x46c] ss:$16 sps:$4 sm:$0xff]  }
  0x93   :  { %1467 = vmatpush1.bf16.msra.mxu1 %v2427_v41  ;;  %1390 = vmatprep.subr.bf16.mxu0 %v2438_v44  ;;  %v2514_v41 = vld [vmem:[#allocation7 + $0x248] ss:$16 sps:$4 sm:$0xff]  }
  0x94   :  { %1468 = vmatprep.subr.bf16.mxu1 %v2435_v43  ;;  %v2517_v43 = vld [vmem:[#allocation7 + $0x468] ss:$16 sps:$4 sm:$0xff]  }
  0x95   :  { %v2520_v44 = vld [vmem:[#allocation7 + $0x228] ss:$16 sps:$4 sm:$0xff]  }
  0x96   :  { %1391 = vmatpush2.bf16.msra.mxu0 %v2436_v46  ;;  %v2528_v46 = vld [vmem:[#allocation7 + $0x20c] ss:$16 sps:$4 sm:$0xff]  }
  0x97   :  { %1469 = vmatpush1.bf16.msra.mxu1 %v2433_v45  ;;  %1392 = vmatprep.subr.bf16.mxu0 %v2444_v48  ;;  %v2525_v45 = vld [vmem:[#allocation7 + $0x44c] ss:$16 sps:$4 sm:$0xff]  }
  0x98   :  { %1470 = vmatprep.subr.bf16.mxu1 %v2441_v47  ;;  %v2526_v47 = vld [vmem:[#allocation7 + $0x208] ss:$16 sps:$4 sm:$0xff]   ;;  %v2531_v48 = vld [vmem:[#allocation7 + $0x42c] ss:$16 sps:$4 sm:$0xff]  }
  0x9a   :  { %1393 = vmatpush2.bf16.msra.mxu0 %v2442_v50  ;;  %v2529_v50 = vld [vmem:[#allocation7 + $0x428] ss:$16 sps:$4 sm:$0xff]  }
  0x9b   :  { %1471 = vmatpush1.bf16.msra.mxu1 %v2439_v49  ;;  %1394 = vmatprep.subr.bf16.mxu0 %v2450_v53  ;;  %v2534_v49 = vld [vmem:[#allocation7 + $0x3ec] ss:$16 sps:$4 sm:$0xff]  }
  0x9c   :  { %1472 = vmatprep.subr.bf16.mxu1 %v2447_v51  ;;  %v2532_v51 = vld [vmem:[#allocation7 + $0x3e8] ss:$16 sps:$4 sm:$0xff]   ;;  %v2537_v53 = vld [vmem:[#allocation7 + $0x40c] ss:$16 sps:$4 sm:$0xff]  }
  0x9e   :  { %1395 = vmatpush2.bf16.msra.mxu0 %v2448_v55  ;;  %v2535_v55 = vld [vmem:[#allocation7 + $0x408] ss:$16 sps:$4 sm:$0xff]  }
  0x9f   :  { %1473 = vmatpush2.bf16.msra.mxu1 %v2445_v54  ;;  %1396 = vmatprep.subr.bf16.mxu0 %v2456_v57  ;;  %v2540_v54 = vld [vmem:[#allocation7 + $0x3cc] ss:$16 sps:$4 sm:$0xff]  }
  0xa0   :  { %1474 = vmatprep.subr.bf16.mxu1 %v2453_v56  ;;  %v2538_v56 = vld [vmem:[#allocation7 + $0x3c8] ss:$16 sps:$4 sm:$0xff]   ;;  %v2543_v57 = vld [vmem:[#allocation7 + $0x5ec] ss:$16 sps:$4 sm:$0xff]  }
  0xa2   :  { %1397 = vmatpush2.bf16.msra.mxu0 %v2454_v59  ;;  %v2541_v59 = vld [vmem:[#allocation7 + $0x5e8] ss:$16 sps:$4 sm:$0xff]  }
  0xa3   :  { %1475 = vmatpush2.bf16.msra.mxu1 %v2451_v58  ;;  %1398 = vmatprep.subr.bf16.mxu0 %v2462_v61  ;;  %v2546_v58 = vld [vmem:[#allocation7 + $0x3ac] ss:$16 sps:$4 sm:$0xff]  }
  0xa4   :  { %1476 = vmatprep.subr.bf16.mxu1 %v2459_v60  ;;  %v2544_v60 = vld [vmem:[#allocation7 + $0x3a8] ss:$16 sps:$4 sm:$0xff]   ;;  %v2549_v61 = vld [vmem:[#allocation7 + $0x5cc] ss:$16 sps:$4 sm:$0xff]  }
  0xa6   :  { %1399 = vmatpush2.bf16.msra.mxu0 %v2460_v63  ;;  %v2547_v63 = vld [vmem:[#allocation7 + $0x5c8] ss:$16 sps:$4 sm:$0xff]  }
  0xa7   :  { %1477 = vmatpush2.bf16.msra.mxu1 %v2457_v62  ;;  %1400 = vmatprep.subr.bf16.mxu0 %v2468_v1  ;;  %v2552_v62 = vld [vmem:[#allocation7 + $0x38c] ss:$16 sps:$4 sm:$0xff]  }
  0xa8   :  { %1478 = vmatprep.subr.bf16.mxu1 %v2465_v0  ;;  %v2550_v0 = vld [vmem:[#allocation7 + $0x388] ss:$16 sps:$4 sm:$0xff]   ;;  %v2555_v1 = vld [vmem:[#allocation7 + $0x5ac] ss:$16 sps:$4 sm:$0xff]  }
  0xaa   :  { %1401 = vmatpush2.bf16.msra.mxu0 %v2466_v3  ;;  %v2553_v3 = vld [vmem:[#allocation7 + $0x5a8] ss:$16 sps:$4 sm:$0xff]  }
  0xab   :  { %1479 = vmatpush2.bf16.msra.mxu1 %v2463_v2  ;;  %1402 = vmatprep.subr.bf16.mxu0 %v2474_v5  ;;  %v2558_v2 = vld [vmem:[#allocation7 + $0x36c] ss:$16 sps:$4 sm:$0xff]  }
  0xac   :  { %1480 = vmatprep.subr.bf16.mxu1 %v2471_v4  ;;  %v2556_v4 = vld [vmem:[#allocation7 + $0x368] ss:$16 sps:$4 sm:$0xff]   ;;  %v2561_v5 = vld [vmem:[#allocation7 + $0x58c] ss:$16 sps:$4 sm:$0xff]  }
  0xae   :  { %1403 = vmatpush2.bf16.msra.mxu0 %v2472_v7  ;;  %v2559_v7 = vld [vmem:[#allocation7 + $0x588] ss:$16 sps:$4 sm:$0xff]  }
  0xaf   :  { %1481 = vmatpush2.bf16.msra.mxu1 %v2469_v6  ;;  %1404 = vmatprep.subr.bf16.mxu0 %v2480_v11  ;;  %v2564_v6 = vld [vmem:[#allocation7 + $0x34c] ss:$16 sps:$4 sm:$0xff]  }
  0xb0   :  { %1482 = vmatprep.subr.bf16.mxu1 %v2477_v10  ;;  %v2562_v10 = vld [vmem:[#allocation7 + $0x348] ss:$16 sps:$4 sm:$0xff]   ;;  %v2567_v11 = vld [vmem:[#allocation7 + $0x56c] ss:$16 sps:$4 sm:$0xff]  }
  0xb2   :  { %1405 = vmatpush2.bf16.msra.mxu0 %v2478_v13  ;;  %v2565_v13 = vld [vmem:[#allocation7 + $0x568] ss:$16 sps:$4 sm:$0xff]  }
  0xb3   :  { %1483 = vmatpush2.bf16.msra.mxu1 %v2475_v12  ;;  %1497 = vmatprep.subr.bf16.mxu0 %v2486_v17  ;;  %v2570_v12 = vld [vmem:[#allocation7 + $0x32c] ss:$16 sps:$4 sm:$0xff]  }
  0xb4   :  { %1484 = vmatprep.subr.bf16.mxu1 %v2483_v14  ;;  %v2568_v14 = vld [vmem:[#allocation7 + $0x328] ss:$16 sps:$4 sm:$0xff]   ;;  %v2576_v17 = vld [vmem:[#allocation7 + $0x30c] ss:$16 sps:$4 sm:$0xff]  }
  0xb5   :  { %1407 = vmatmul.mubr.bf16.vlgmr.msra.gmra.mxu0 %v2808_v20 }
  0xb6   :  { %1498 = vmatpush1.bf16.msra.mxu0 %v2484_v21  ;;  %1529 = vmatprep.mubr.bf16.mxu0 %v2789_v52  ;;  %v2513_v52 = vld [vmem:[#allocation7 + $0x48c] ss:$16 sps:$4 sm:$0xff]   ;;  %v2574_v21 = vld [vmem:[#allocation7 + $0x308] ss:$16 sps:$4 sm:$0xff]  }
  0xb7   :  { %1485 = vmatpush2.bf16.msra.mxu1 %v2481_v18  ;;  %1499 = vmatprep.subr.bf16.mxu0 %v2492_v23  ;;  %v2571_v18 = vld [vmem:[#allocation7 + $0x548] ss:$16 sps:$4 sm:$0xff]   ;;  %v2582_v23 = vld [vmem:[#allocation7 + $0x60c] ss:$16 sps:$4 sm:$0xff]  }
  0xb8   :  { %1486 = vmatprep.subr.bf16.mxu1 %v2489_v22  ;;  %v2579_v22 = vld [vmem:[#allocation7 + $0x52c] ss:$16 sps:$4 sm:$0xff]  }
  0xba   :  { %1500 = vmatpush1.bf16.msra.mxu0 %v2490_v25  ;;  %v2580_v25 = vld [vmem:[#allocation7 + $0x608] ss:$16 sps:$4 sm:$0xff]  }
  0xbb   :  { %1487 = vmatpush2.bf16.msra.mxu1 %v2487_v24  ;;  %1501 = vmatprep.subr.bf16.mxu0 %v2498_v27  ;;  %v2577_v24 = vld [vmem:[#allocation7 + $0x528] ss:$16 sps:$4 sm:$0xff]  }
  0xbc   :  { %1538 = vmatprep.subr.bf16.mxu1 %v2495_v26  ;;  %v2585_v26 = vld [vmem:[#allocation7 + $0x50c] ss:$16 sps:$4 sm:$0xff]  }
  0xbd   :  { %v2586_v27 = vld [vmem:[#allocation8 + $0x78] sm:$0xff]  }
  0xbe   :  { %1489 = vmatmul.mubr.bf16.vlgmr.msra.gmra.mxu1 %v2793_v8  ;;  %1502 = vmatpush1.bf16.msra.mxu0 %v2496_v29  ;;  %v2522_v8 = vld [vmem:[#allocation7 + $0x22c] ss:$16 sps:$4 sm:$0xff]  }
  0xbf   :  { %1539 = vmatpush1.bf16.msra.mxu1 %v2493_v28  ;;  %1503 = vmatprep.subr.bf16.mxu0 %v2504_v31  ;;  %v2583_v28 = vld [vmem:[#allocation7 + $0x508] ss:$16 sps:$4 sm:$0xff]   ;;  %v2589_v31 = vld [vmem:[#allocation8 + $0x30] sm:$0xff]  }
  0xc0   :  { %1540 = vmatprep.subr.bf16.mxu1 %v2501_v30  ;;  %1570 = vmatprep.mubr.bf16.mxu1 %v2805_v36  ;;  %v2523_v36 = vld [vmem:[#allocation7 + $0x448] ss:$16 sps:$4 sm:$0xff]   ;;  %v2588_v30 = vld [vmem:[#allocation8 + $0x70] sm:$0xff]  }
  0xc1   :  { %v2587_v29 = vld [vmem:[#allocation8 + $0x38] sm:$0xff]  }
  0xc2   :  { %1504 = vmatpush1.bf16.msra.mxu0 %v2502_v33  ;;  %v2592_v33 = vld [vmem:[#allocation8 + $0x60] sm:$0xff]  }
  0xc3   :  { %1541 = vmatpush1.bf16.msra.mxu1 %v2499_v32  ;;  %1505 = vmatprep.subr.bf16.mxu0 %v2510_v35  ;;  %v2590_v32 = vld [vmem:[#allocation8 + $0x68] sm:$0xff]   ;;  %v2603_v35 = vld [vmem:[#allocation8 + $0xb8] sm:$0xff]  }
  0xc4   :  { %1542 = vmatprep.subr.bf16.mxu1 %v2507_v34  ;;  %v2602_v34 = vld [vmem:[#allocation8 + $0xf8] sm:$0xff]  }
  0xc6   :  { %1506 = vmatpush1.bf16.msra.mxu0 %v2508_v38  ;;  %v2605_v38 = vld [vmem:[#allocation8 + $0xb0] sm:$0xff]  }
  0xc7   :  { %1543 = vmatpush1.bf16.msra.mxu1 %v2505_v37  ;;  %1507 = vmatprep.subr.bf16.mxu0 %v2516_v39  ;;  %v2593_v37 = vld [vmem:[#allocation8 + $0x20] sm:$0xff]   ;;  %v2607_v39 = vld [vmem:[#allocation8 + $0xa8] sm:$0xff]  }
  0xc8   :  { %1544 = vmatprep.subr.bf16.mxu1 %v2513_v52  ;;  %v2595_v52 = vld [vmem:[#allocation8 + $0x18] sm:$0xff]  }
  0xca   :  { %1508 = vmatpush1.bf16.msra.mxu0 %v2514_v41  ;;  %v2608_v41 = vld [vmem:[#allocation8 + $0xe0] sm:$0xff]  }
  0xcb   :  { %1545 = vmatpush1.bf16.msra.mxu1 %v2511_v40  ;;  %1509 = vmatprep.subr.bf16.mxu0 %v2522_v8  ;;  %v2596_v40 = vld [vmem:[#allocation8 + $0x50] sm:$0xff]   ;;  %v2598_v8 = vld [vmem:[#allocation8 + $0x48] sm:$0xff]  }
  0xcc   :  { %1546 = vmatprep.subr.bf16.mxu1 %v2519_v42  ;;  %v2597_v42 = vld [vmem:[#allocation8 + $0x10] sm:$0xff]  }
  0xce   :  { %1510 = vmatpush1.bf16.msra.mxu0 %v2520_v44  ;;  %v2600_v44 = vld [vmem:[#allocation8 + $0x40] sm:$0xff]  }
  0xcf   :  { %1547 = vmatpush1.bf16.msra.mxu1 %v2517_v43  ;;  %1511 = vmatprep.subr.bf16.mxu0 %v2528_v46  ;;  %v2599_v43 = vld [vmem:[#allocation8 + $0x8] sm:$0xff]   ;;  %v2609_v46 = vld [vmem:[#allocation8 + $0xa0] sm:$0xff]  }
  0xd0   :  { %1548 = vmatprep.subr.bf16.mxu1 %v2525_v45  ;;  %v2601_v45 = vld [vmem:[#allocation8] sm:$0xff]  }
  0xd2   :  { %1512 = vmatpush1.bf16.msra.mxu0 %v2526_v47 }
  0xd3   :  { %1549 = vmatpush1.bf16.msra.mxu1 %v2523_v36  ;;  %1513 = vmatprep.subr.bf16.mxu0 %v2534_v49 }
  0xd4   :  { %1550 = vmatprep.subr.bf16.mxu1 %v2531_v48 }
  0xd6   :  { %1514 = vmatpush2.bf16.msra.mxu0 %v2532_v51  ;;  %v2611_v51 = vld [vmem:[#allocation8 + $0x98] sm:$0xff]  }
  0xd7   :  { %1551 = vmatpush1.bf16.msra.mxu1 %v2529_v50  ;;  %1515 = vmatprep.subr.bf16.mxu0 %v2540_v54  ;;  %v2610_v50 = vld [vmem:[#allocation8 + $0xd8] sm:$0xff]  }
  0xd8   :  { %1552 = vmatprep.subr.bf16.mxu1 %v2537_v53 }
  0xda   :  { %1516 = vmatpush2.bf16.msra.mxu0 %v2538_v56 }
  0xdb   :  { %1553 = vmatpush1.bf16.msra.mxu1 %v2535_v55  ;;  %1517 = vmatprep.subr.bf16.mxu0 %v2546_v58  ;;  %v2613_v58 = vld [vmem:[#allocation8 + $0x90] sm:$0xff]  }
  0xdc   :  { %1554 = vmatprep.subr.bf16.mxu1 %v2543_v57  ;;  %v2612_v57 = vld [vmem:[#allocation8 + $0xd0] sm:$0xff]  }
  0xde   :  { %1518 = vmatpush2.bf16.msra.mxu0 %v2544_v60 }
  0xdf   :  { %1555 = vmatpush2.bf16.msra.mxu1 %v2541_v59  ;;  %1519 = vmatprep.subr.bf16.mxu0 %v2552_v62  ;;  %v2615_v62 = vld [vmem:[#allocation8 + $0x88] sm:$0xff]  }
  0xe0   :  { %1556 = vmatprep.subr.bf16.mxu1 %v2549_v61  ;;  %v2614_v61 = vld [vmem:[#allocation8 + $0xc8] sm:$0xff]  }
  0xe2   :  { %1520 = vmatpush2.bf16.msra.mxu0 %v2550_v0 }
  0xe3   :  { %1557 = vmatpush2.bf16.msra.mxu1 %v2547_v63  ;;  %1521 = vmatprep.subr.bf16.mxu0 %v2558_v2  ;;  %v2617_v2 = vld [vmem:[#allocation8 + $0x80] sm:$0xff]  }
  0xe4   :  { %1558 = vmatprep.subr.bf16.mxu1 %v2555_v1  ;;  %v2616_v1 = vld [vmem:[#allocation8 + $0xc0] sm:$0xff]  }
  0xe6   :  { %1522 = vmatpush2.bf16.msra.mxu0 %v2556_v4 }
  0xe7   :  { %1559 = vmatpush2.bf16.msra.mxu1 %v2553_v3  ;;  %1523 = vmatprep.subr.bf16.mxu0 %v2564_v6  ;;  %v288_v3 = vlaneseq  ;;  %v286_v6 = vld [vmem:[%s2831_s3] sm:$0xf] }
  0xe8   :  { %1560 = vmatprep.subr.bf16.mxu1 %v2561_v5 }
  0xe9   :  { %v289_v4 = vshrl.u32 %v288_v3, 7 }
  0xea   :  { %1524 = vmatpush2.bf16.msra.mxu0 %v2562_v10 }
  0xeb   :  { %1561 = vmatpush2.bf16.msra.mxu1 %v2559_v7  ;;  %1525 = vmatprep.subr.bf16.mxu0 %v2570_v12  ;;  %v290_v5 = vsub.s32 0, %v289_v4  ;;  %v294_v7 = vsub.s32 1, %v289_v4 }
  0xec   :  { %1562 = vmatprep.subr.bf16.mxu1 %v2567_v11 }
  0xed   :  { %v291_v10 = vrot.slane %v286_v6, %v290_v5  ;;  %v295_v11 = vrot.slane %v286_v6, %v294_v7 }
  0xee   :  { %1526 = vmatpush2.bf16.msra.mxu0 %v2568_v14 }
  0xef   :  { %1563 = vmatpush2.bf16.msra.mxu1 %v2565_v13  ;;  %1527 = vmatprep.subr.bf16.mxu0 %v2576_v17 }
  0xf0   :  { %1564 = vmatprep.subr.bf16.mxu1 %v2573_v15 }
  0xf2   :  { %1528 = vmatpush2.bf16.msra.mxu0 %v2574_v21 }
  0xf3   :  { %1565 = vmatpush2.bf16.msra.mxu1 %v2571_v18  ;;  %1593 = vmatprep.subr.bf16.mxu0 %v2582_v23 }
  0xf4   :  { %1566 = vmatprep.subr.bf16.mxu1 %v2579_v22 }
  0xf5   :  { %1530 = vmatmul.mubr.bf16.vlgmr.msra.gmra.mxu0 %v2795_v9  ;;  %v2591_v9 = vld [vmem:[#allocation8 + $0x28] sm:$0xff]  }
  0xf6   :  { %1594 = vmatpush1.bf16.msra.mxu0 %v2580_v25  ;;  %1611 = vmatprep.mubr.bf16.mxu0 %v2736_v16  ;;  %v2604_v16 = vld [vmem:[#allocation8 + $0xf0] sm:$0xff]  }
  0xf7   :  { %1567 = vmatpush2.bf16.msra.mxu1 %v2577_v24  ;;  %2236 = vmatprep.subr.bf16.mxu0 %v2586_v27 }
  0xf8   :  { %1568 = vmatprep.subr.bf16.mxu1 %v2585_v26 }
  0xfb   :  { %1569 = vmatpush2.bf16.msra.mxu1 %v2583_v28 }
  0xfc   :  { %2258 = vmatprep.subr.bf16.mxu1 %v2602_v34  ;;  %v298_v34 = vsub.s32 2, %v289_v4 }
  0xfd   :  { %2202 = vmatmul.mubr.msk.bf16.vlgmr.msra.gmra.mxu0 %vm1288_vm0, %v2800_v19  ;;  %v2606_v19 = vld [vmem:[#allocation8 + $0xe8] sm:$0xff]  }
  0xfe   :  { %1571 = vmatmul.mubr.bf16.vlgmr.msra.gmra.mxu1 %v2808_v20  ;;  %2237 = vmatpush3.bf16.msra.mxu0 %v2587_v29  ;;  %v2594_v20 = vld [vmem:[#allocation8 + $0x58] sm:$0xff]  }
  0xff   :  { %2238 = vmatprep.subr.bf16.mxu0 %v2588_v30  ;;  %2259 = vmatpush3.bf16.msra.mxu1 %v2603_v35  ;;  %v302_v35 = vsub.s32 3, %v289_v4 }
 0x100   :  { %2260 = vmatprep.subr.bf16.mxu1 %v2604_v16 }
 0x102   :  { %2239 = vmatpush3.bf16.msra.mxu0 %v2589_v31 }
 0x103   :  { %2240 = vmatprep.subr.bf16.mxu0 %v2590_v32  ;;  %2261 = vmatpush3.bf16.msra.mxu1 %v2605_v38 }
 0x104   :  { %2262 = vmatprep.subr.bf16.mxu1 %v2606_v19 }
 0x106   :  { %2241 = vmatpush3.bf16.msra.mxu0 %v2591_v9 }
 0x107   :  { %2242 = vmatprep.subr.bf16.mxu0 %v2592_v33  ;;  %2263 = vmatpush3.bf16.msra.mxu1 %v2607_v39 }
 0x108   :  { %2264 = vmatprep.subr.bf16.mxu1 %v2608_v41 }
 0x10a   :  { %2243 = vmatpush3.bf16.msra.mxu0 %v2593_v37  ;;  %v299_v37 = vrot.slane %v286_v6, %v298_v34 }
 0x10b   :  { %2244 = vmatprep.subr.bf16.mxu0 %v2594_v20  ;;  %2265 = vmatpush3.bf16.msra.mxu1 %v2609_v46  ;;  %v303_v20 = vrot.slane %v286_v6, %v302_v35 }
 0x10c   :  { %2266 = vmatprep.subr.bf16.mxu1 %v2610_v50 }
 0x10e   :  { %2245 = vmatpush3.bf16.msra.mxu0 %v2595_v52 }
 0x10f   :  { %2246 = vmatprep.subr.bf16.mxu0 %v2596_v40  ;;  %2267 = vmatpush3.bf16.msra.mxu1 %v2611_v51 }
 0x110   :  { %2268 = vmatprep.subr.bf16.mxu1 %v2612_v57 }
 0x112   :  { %2247 = vmatpush3.bf16.msra.mxu0 %v2597_v42 }
 0x113   :  { %2248 = vmatprep.subr.bf16.mxu0 %v2598_v8  ;;  %2269 = vmatpush3.bf16.msra.mxu1 %v2613_v58 }
 0x114   :  { %2270 = vmatprep.subr.bf16.mxu1 %v2614_v61 }
 0x116   :  { %2249 = vmatpush3.bf16.msra.mxu0 %v2599_v43 }
 0x117   :  { %2250 = vmatprep.subr.bf16.mxu0 %v2600_v44  ;;  %2271 = vmatpush3.bf16.msra.mxu1 %v2615_v62 }
 0x118   :  { %2272 = vmatprep.subr.bf16.mxu1 %v2616_v1 }
 0x11a   :  { %2251 = vmatpush3.bf16.msra.mxu0 %v2601_v45 }
 0x11b   :  { %2273 = vmatpush3.bf16.msra.mxu1 %v2617_v2 }
 0x135   :  { %v1326_v36 = vpop.f32.mrf.mxu0 }
 0x136   :  { %v1367_v47 = vpop.f32.mrf.mxu1  ;;  %v1327_v12 = vadd.f32 %v1326_v36, %v291_v10 }
 0x137   :  { %v1328_v48 = vpop.f32.mrf.mxu0 }
 0x138   :  { %v1369_v49 = vpop.f32.mrf.mxu1  ;;  %v1329_v13 = vadd.f32 %v1328_v48, %v295_v11  ;;  %v1368_v14 = vadd.f32 %v1367_v47, %v1327_v12  ;;  %v1974_v12 = vld [vmem:[#allocation5] sm:$0xff] }
 0x139   :  { %v1330_v53 = vpop.f32.mrf.mxu0 }
 0x13a   :  { %v1371_v54 = vpop.f32.mrf.mxu1  ;;  %v1370_v17 = vadd.f32 %v1369_v49, %v1329_v13 }
 0x13b   :  { %v1331_v55 = vpop.f32.mrf.mxu0 }
 0x13c   :  { %v1372_v56 = vpop.f32.mrf.mxu1 }
 0x13e   :  { %v1449_v59 = vpop.f32.mrf.mxu1 }
 0x140   :  { %v1451_v60 = vpop.f32.mrf.mxu1 }
 0x142   :  { %v1453_v63 = vpop.f32.mrf.mxu1 }
 0x143   :  { %v2203_v63 = vld [vmem:[%s2833_s5] ss:$0 sm:$0xff]  ;;  %s1994_s5 = sshll.u32 %s2739_s22, 4  ;;  %s1995_s5 = int_to_ptr.vmem [resolvable:$true] %s1994_s5 }
 0x144   :  { %v1454_v0 = vpop.f32.mrf.mxu1  ;;  %s2700_s23 = scalar_lea.vmem %s1995_s5, 128  ;;  %p2705_p7 = scmp.lt.s32.totalorder %s1995_s5, %s1995_s5 }
 0x145   :  { %p2701_p6 = scmp.ne.s32.totalorder %s1995_s5, %s2700_s23  ;;  %p2706_p8 = scmp.lt.s32.totalorder %s2700_s23, %s2700_s23 }
 0x147   :  { %p2707_p9 = por %p2706_p8, %p2705_p7 }
 0x149   :  { %p2708_p10 = pnand %p2707_p9, %p2701_p6 }
 0x175   :  { %v1408_v15 = vpop.f32.mrf.mxu0 }
 0x176   :  { %v1409_v18 = vadd.f32 %v1408_v15, %v1368_v14 }
 0x177   :  { %v1410_v21 = vpop.f32.mrf.mxu0 }
 0x178   :  { %v1450_v22 = vadd.f32 %v1449_v59, %v1409_v18  ;;  %v1411_v23 = vadd.f32 %v1410_v21, %v1370_v17 }
 0x179   :  { %v1412_v24 = vpop.f32.mrf.mxu0 }
 0x17a   :  { %v1452_v25 = vadd.f32 %v1451_v60, %v1411_v23  ;;  %v1620_v26 = vmax.f32 %v1450_v22, 0.0 }
 0x17b   :  { %v1413_v27 = vpop.f32.mrf.mxu0 }
 0x17c   :  { %v1621_v28 = vmax.f32 %v1452_v25, 0.0  ;;  %v1624_v31 = vpack.c.bf16 %v1620_v26, %v1620_v26 }
 0x17e   :  { %v1490_v29 = vpop.f32.mrf.mxu1  ;;  %v1625_v30 = vpack.c.bf16 %v1621_v28, %v1621_v28 }
 0x17f   :  { %v1491_v52 = vadd.f32 %v1490_v29, %v299_v37 }
 0x180   :  { %v1492_v32 = vpop.f32.mrf.mxu1  ;;  %1923 = vmatprep.mubr.bf16.mxu0 %v1625_v30 }
 0x181   :  { %1924 = vmatmul.mubr.bf16.vlgmr.msra.gmra.mxu0 %v1624_v31  ;;  %v1493_v40 = vadd.f32 %v1492_v32, %v303_v20 }
 0x182   :  { %v1494_v9 = vpop.f32.mrf.mxu1 }
 0x184   :  { %v1495_v33 = vpop.f32.mrf.mxu1 }
 0x1b5   :  { %v1531_v16 = vpop.f32.mrf.mxu0 }
 0x1b6   :  { %v1532_v41 = vadd.f32 %v1531_v16, %v1491_v52 }
 0x1b7   :  { %v1533_v38 = vpop.f32.mrf.mxu0 }
 0x1b8   :  { %v1534_v43 = vadd.f32 %v1533_v38, %v1493_v40 }
 0x1b9   :  { %v1535_v19 = vpop.f32.mrf.mxu0 }
 0x1bb   :  { %v1536_v39 = vpop.f32.mrf.mxu0 }
 0x1bd   :  { %v1613_v8 = vpop.f32.mrf.mxu0 }
 0x1be   :  { %v1572_v42 = vpop.f32.mrf.mxu1 }
 0x1bf   :  { %v1573_v44 = vadd.f32 %v1572_v42, %v1532_v41  ;;  %v1615_v46 = vpop.f32.mrf.mxu0 }
 0x1c0   :  { %v1574_v45 = vpop.f32.mrf.mxu1 }
 0x1c1   :  { %v1614_v36 = vadd.f32 %v1613_v8, %v1573_v44  ;;  %v1575_v47 = vadd.f32 %v1574_v45, %v1534_v43  ;;  %v1617_v49 = vpop.f32.mrf.mxu0 }
 0x1c2   :  { %v1576_v48 = vpop.f32.mrf.mxu1 }
 0x1c3   :  { %v1616_v50 = vadd.f32 %v1615_v46, %v1575_v47  ;;  %v1622_v51 = vmax.f32 %v1614_v36, 0.0  ;;  %v1618_v54 = vpop.f32.mrf.mxu0 }
 0x1c4   :  { %v1577_v53 = vpop.f32.mrf.mxu1 }
 0x1c5   :  { %v1623_v55 = vmax.f32 %v1616_v50, 0.0  ;;  %v1626_v57 = vpack.c.bf16 %v1622_v51, %v1622_v51 }
 0x1c7   :  { %v1627_v56 = vpack.c.bf16 %v1623_v55, %v1623_v55 }
 0x1c9   :  { %1963 = vmatprep.mubr.bf16.mxu1 %v1627_v56 }
 0x1ca   :  { %1964 = vmatmul.mubr.bf16.vlgmr.msra.gmra.mxu1 %v1626_v57 }
 0x241   :  { %v2252_v58 = vpop.f32.mrf.mxu0 }
 0x243   :  { %v2253_v59 = vpop.f32.mrf.mxu0 }
 0x244   :  { %v2254_v60 = vadd.f32 %v2253_v59, %v2252_v58 }
 0x245   :  { %v2255_v61 = vpop.f32.mrf.mxu0 }
 0x246   :  { %v1926_v2 = vadd.f32 %v2254_v60, %v2203_v63 }
 0x247   :  { %v2256_v62 = vpop.f32.mrf.mxu0 }
 0x28a   :  { %v2274_v0 = vpop.f32.mrf.mxu1 }
 0x28c   :  { %v2275_v1 = vpop.f32.mrf.mxu1 }
 0x28d   :  { %v2276_v3 = vadd.f32 %v2275_v1, %v2274_v0 }
 0x28e   :  { %v2277_v4 = vpop.f32.mrf.mxu1 }
 0x28f   :  { %v1966_v5 = vadd.f32 %v2276_v3, %v1926_v2 }
 0x290   :  { %v2278_v6 = vpop.f32.mrf.mxu1 }
 0x291   :  { %v1971_v7 = vmul.f32 0.5, %v1966_v5  ;;  %1985 = vst [vmem:[#allocation10] sm:$0xff] %v1966_v5 }
 0x293   :  { %v1972_v10 = vmul.f32 1.442695, %v1971_v7 }
 0x295   :  { %2618 = vpow2.f32 %v1972_v10 }
 0x2a2   :  { %v2619_v11 = vpop.eup %2618 }
 0x2a3   :  { %1976 = vrot.lane.b32.xlu0 %v2619_v11, %s2737_s20 }
 0x2a7   :  { %1981 = vrot.lane.b32.xlu0 %v1966_v5, %s2738_s21 }
 0x315   :  { %v1977_v13 = vpop.permute.xlu0 %1976 }
 0x316   :  { %v1979_v14 = vmul.f32 %v1977_v13, %v1974_v12 }
 0x319   :  { %v1982_v15 = vpop.permute.xlu0 %1981 }
 0x31a   :  { %v1984_v17 = vadd.f32 %v1982_v15, %v1979_v14 }
 0x31c   :  { %1987 = vst.msk [vmem:[#allocation10] sm:$0xff] %vm1986_vm1, %v1984_v17 }
 0x31d   :  { %2711 = shalt.err (!%p2708_p10)
}
 0x31e   :  { %1997 = dma.vmem_to_hbm [thread:$0]  %s1995_s5, 128, %s2834_s6, [#allocation4]  }
 0x31f   :  { %2726 = dma.done.wait [#allocation4], 128  }
 0x320   :  { %2727 = vsyncadd [#allocation4], 4294967168 }
 0x321   :  { %2001 = vsyncpa [#allocation3], 1 }
 0x322   :  { %2002 = vsyncpa [#allocation6], 1 }
 0x323   :  { %2003 = vsyncpa [#allocation9], 1 }
 0x324   :  { %2004 = vsyncpa [#allocation4], 1 }

</bundles_post_ra>
